<compile_context>
chip_gen: v5e
topology: v5e:2x2
jax: 0.10.0
libtpu: 0.0.40
codegen_flags: <defaults>
</compile_context>

<pallas_src>
import math

import jax
import jax.numpy as jnp
from jax.experimental import pallas as pl
from jax.experimental.pallas import tpu as pltpu

INPUT_DIM = 35
HIDDEN_DIM = 64
# valid head rows of the fused output: [0:2]=policy logits, [2]=value, [3]=tp, [4]=sl, [5]=lev
HEAD_DIM = 6
HEAD_PAD = 8          # pad to 8 rows -> whole-vreg (8,128) output stores

LANE = 128
TB_MAX = 8192         # batch tile; double-buffered f32 (tb,35) tiles + temps stay <~16 MiB


def _round_up(n, m):
    return (n + m - 1) // m * m


def _cdiv(a, b):
    return (a + b - 1) // b


def _choose_batch_tile(batch):
    """Pick (tile, padded_batch). Small batches: one tile. Large batches: >=4 tiles."""
    padded0 = _round_up(max(batch, 1), LANE)
    if padded0 <= 8 * LANE:
        tb = padded0
    else:
        # Target >= 4 grid steps so v7x's 2 TensorCores each get >= 2 tiles,
        # while keeping tiles big enough to amortize per-step pipeline overhead.
        tb = _round_up(_cdiv(padded0, 4), LANE)
        tb = max(2 * LANE, min(tb, TB_MAX))
    padded_b = _round_up(batch, tb)
    return tb, padded_b


def _unified_rl_kernel(x_ref, w1_ref, b1_ref, wh_ref, bh_ref, out_ref):
    # x_ref  : (TB, INPUT_DIM)          f32   natural HBM layout (no wrapper relayout)
    # w1_ref : (HIDDEN_DIM, INPUT_DIM)  bf16  (torch (out, in) layout), resident
    # b1_ref : (HIDDEN_DIM, 1)          f32   resident
    # wh_ref : (HEAD_PAD, HIDDEN_DIM)   bf16  five heads stacked on rows + 2 zero rows
    # bh_ref : (HEAD_PAD, 1)            f32
    # out_ref: (HEAD_PAD, TB)           f32   lane-dense output (batch on lanes)
    x = x_ref[...].astype(jnp.bfloat16)
    # Contract the shared feature axis of w1 (dim 1) and x (dim 1) -> (HIDDEN, TB).
    # The batch-major -> batch-on-lanes "transpose" happens inside the MXU/VMEM.
    h = jax.lax.dot_general(
        w1_ref[...], x,
        dimension_numbers=(((1,), (1,)), ((), ())),
        preferred_element_type=jnp.float32)
    h = jnp.maximum(h + b1_ref[...], 0.0)                       # (H, TB) + (H, 1)
    o = jnp.dot(wh_ref[...], h.astype(wh_ref.dtype),
                preferred_element_type=jnp.float32)             # (8, TB)
    out_ref[...] = o + bh_ref[...]                              # (8, TB) + (8, 1)


def unified_rl_forward(x, params):
    """x: (B, ...) flattened to (B, INPUT_DIM). Returns (logits, value, tp, sl, lev)."""
    B = x.shape[0]
    x2d = x.reshape(B, -1)
    assert x2d.shape[1] == INPUT_DIM, f"expected flattened dim {INPUT_DIM}, got {x2d.shape[1]}"

    tb, padded_b = _choose_batch_tile(B)
    x_in = x2d if padded_b == B else jnp.pad(x2d, ((0, padded_b - B), (0, 0)))

    w1 = params["w1"].astype(jnp.bfloat16)                      # (H, IN)      tiny, resident
    wh = params["wh"].astype(jnp.bfloat16)                      # (HEAD_PAD,H) tiny, resident
    b1 = params["b1"]                                           # (H, 1)   f32
    bh = params["bh"]                                           # (8, 1)   f32

    grid = (padded_b // tb,)
    flops = 2 * padded_b * (INPUT_DIM * HIDDEN_DIM + HIDDEN_DIM * HEAD_PAD)
    bytes_accessed = (x_in.size * 4 + w1.size * 2 + wh.size * 2
                      + b1.size * 4 + bh.size * 4 + HEAD_PAD * padded_b * 4)

    out_t = pl.pallas_call(
        _unified_rl_kernel,
        out_shape=jax.ShapeDtypeStruct((HEAD_PAD, padded_b), jnp.float32),
        grid_spec=pltpu.PrefetchScalarGridSpec(
            num_scalar_prefetch=0,
            grid=grid,
            in_specs=[
                pl.BlockSpec((tb, INPUT_DIM), lambda i: (i, 0)),          # x tile (natural layout)
                pl.BlockSpec((HIDDEN_DIM, INPUT_DIM), lambda i: (0, 0)),  # w1 (resident)
                pl.BlockSpec((HIDDEN_DIM, 1), lambda i: (0, 0)),          # b1 (resident)
                pl.BlockSpec((HEAD_PAD, HIDDEN_DIM), lambda i: (0, 0)),   # wh (resident)
                pl.BlockSpec((HEAD_PAD, 1), lambda i: (0, 0)),            # bh (resident)
            ],
            out_specs=pl.BlockSpec((HEAD_PAD, tb), lambda i: (0, i)),
        ),
        compiler_params=pltpu.CompilerParams(
            dimension_semantics=("parallel",),
            vmem_limit_bytes=32 * 1024 * 1024,
        ),
        cost_estimate=pl.CostEstimate(
            flops=flops, transcendentals=0, bytes_accessed=bytes_accessed),
    )(x_in, w1, b1, wh, bh)

    # Module contract requires (B, k) row-major outputs: one small transpose of
    # the valid (6, B) slab.  (Consumers that can read head-major data should
    # take out_t[0:2], out_t[2:3], ... directly and skip this pass.)
    out = jnp.transpose(out_t[:HEAD_DIM, :B])                   # (B, 6)
    logits = out[:, 0:2]
    value = out[:, 2:3]
    tp = out[:, 3:4]
    sl = out[:, 4:5]
    lev = out[:, 5:6]
    return logits, value, tp, sl, lev


def _xavier_uniform(key, fan_out, fan_in):
    # matches torch.nn.init.xavier_uniform_ bound; stored (out, in) like torch Linear
    a = math.sqrt(6.0 / (fan_in + fan_out))
    return jax.random.uniform(key, (fan_out, fan_in), jnp.float32, minval=-a, maxval=a)


def init_params(key):
    k1, k2, k3, k4, k5, k6 = jax.random.split(key, 6)
    w1 = _xavier_uniform(k1, HIDDEN_DIM, INPUT_DIM)             # shared Linear (64, 35)
    b1 = jnp.zeros((HIDDEN_DIM, 1), jnp.float32)
    # five heads, each Linear(hidden, out); fused into one (HEAD_PAD, H) matrix
    w_policy = _xavier_uniform(k2, 2, HIDDEN_DIM)
    w_value = _xavier_uniform(k3, 1, HIDDEN_DIM)
    w_tp = _xavier_uniform(k4, 1, HIDDEN_DIM)
    w_sl = _xavier_uniform(k5, 1, HIDDEN_DIM)
    w_lev = _xavier_uniform(k6, 1, HIDDEN_DIM)
    w_pad = jnp.zeros((HEAD_PAD - HEAD_DIM, HIDDEN_DIM), jnp.float32)
    wh = jnp.concatenate([w_policy, w_value, w_tp, w_sl, w_lev, w_pad], axis=0)  # (8, 64)
    bh = jnp.zeros((HEAD_PAD, 1), jnp.float32)
    return {"w1": w1, "b1": b1, "wh": wh, "bh": bh}


if __name__ == "__main__":
    key = jax.random.PRNGKey(0)
    pkey, xkey = jax.random.split(key)
    params = init_params(pkey)

    B = 2
    x = jax.random.normal(xkey, (B, INPUT_DIM), jnp.float32)

    logits, value, tp, sl, lev = unified_rl_forward(x, params)
    jax.block_until_ready((logits, value, tp, sl, lev))

    # reference in plain JAX, with the same bf16 quantization as the kernel
    x_q = x.astype(jnp.bfloat16).astype(jnp.float32)
    w1_q = params["w1"].astype(jnp.bfloat16).astype(jnp.float32)
    wh_q = params["wh"].astype(jnp.bfloat16).astype(jnp.float32)
    h_ref = jnp.maximum(x_q @ w1_q.T + params["b1"].T, 0.0)
    h_q = h_ref.astype(jnp.bfloat16).astype(jnp.float32)
    o_ref = h_q @ wh_q[:HEAD_DIM].T + params["bh"][:HEAD_DIM].T   # (B, 6)

    assert jnp.allclose(logits, o_ref[:, 0:2], atol=2e-3, rtol=2e-3)
    assert jnp.allclose(value, o_ref[:, 2:3], atol=2e-3, rtol=2e-3)
    assert jnp.allclose(tp, o_ref[:, 3:4], atol=2e-3, rtol=2e-3)
    assert jnp.allclose(sl, o_ref[:, 4:5], atol=2e-3, rtol=2e-3)
    assert jnp.allclose(lev, o_ref[:, 5:6], atol=2e-3, rtol=2e-3)
    assert logits.shape == (B, 2) and value.shape == (B, 1)
    assert tp.shape == (B, 1) and sl.shape == (B, 1) and lev.shape == (B, 1)

    print("KERNEL_OK")
</pallas_src>

<mosaic_0001>
module attributes {stable_mosaic.version = 11 : i64} {
  func.func @_unified_rl_kernel(%arg0: i32, %arg1: memref<128x35xf32, #tpu.memory_space<vmem>>, %arg2: memref<64x35xbf16, #tpu.memory_space<vmem>>, %arg3: memref<64x1xf32, #tpu.memory_space<vmem>>, %arg4: memref<8x64xbf16, #tpu.memory_space<vmem>>, %arg5: memref<8x1xf32, #tpu.memory_space<vmem>>, %arg6: memref<8x128xf32, #tpu.memory_space<vmem>>) attributes {dimension_semantics = [#tpu.dimension_semantics<parallel>], iteration_bounds = array<i64: 1>, scalar_prefetch = 0 : i64, scratch_operands = 0 : i64, tpu.core_type = #tpu.core_type<tc>, window_params = [{transform_indices = @transform_0, window_bounds = array<i64: 128, 35>}, {pipeline_mode = #tpu.pipeline_mode<synchronous>, transform_indices = @transform_1, window_bounds = array<i64: 64, 35>}, {pipeline_mode = #tpu.pipeline_mode<synchronous>, transform_indices = @transform_2, window_bounds = array<i64: 64, 1>}, {pipeline_mode = #tpu.pipeline_mode<synchronous>, transform_indices = @transform_3, window_bounds = array<i64: 8, 64>}, {pipeline_mode = #tpu.pipeline_mode<synchronous>, transform_indices = @transform_4, window_bounds = array<i64: 8, 1>}, {transform_indices = @transform_5, window_bounds = array<i64: 8, 128>}]} {
    %c0 = arith.constant 0 : index
    %c0_0 = arith.constant 0 : index
    %0 = vector.load %arg1[%c0, %c0_0] : memref<128x35xf32, #tpu.memory_space<vmem>>, vector<128x35xf32>
    %1 = arith.truncf %0 : vector<128x35xf32> to vector<128x35xbf16>
    %c0_1 = arith.constant 0 : index
    %c0_2 = arith.constant 0 : index
    %2 = vector.load %arg2[%c0_1, %c0_2] : memref<64x35xbf16, #tpu.memory_space<vmem>>, vector<64x35xbf16>
    %cst = arith.constant dense<0.000000e+00> : vector<64x128xf32>
    %3 = tpu.matmul %2, %1, %cst {dimension_numbers = #tpu.dot_dimension_numbers<[1], [1], [0], [0], [0, 0, 1, 0], [], []>} : vector<64x35xbf16>, vector<128x35xbf16>, vector<64x128xf32> -> vector<64x128xf32>
    %c0_3 = arith.constant 0 : index
    %c0_4 = arith.constant 0 : index
    %4 = vector.load %arg3[%c0_3, %c0_4] : memref<64x1xf32, #tpu.memory_space<vmem>>, vector<64x1xf32>
    %5 = vector.broadcast %4 : vector<64x1xf32> to vector<64x128xf32>
    %6 = arith.addf %3, %5 : vector<64x128xf32>
    %cst_5 = arith.constant 0.000000e+00 : f32
    %7 = vector.broadcast %cst_5 : f32 to vector<64x128xf32>
    %8 = arith.maximumf %6, %7 : vector<64x128xf32>
    %c0_6 = arith.constant 0 : index
    %c0_7 = arith.constant 0 : index
    %9 = vector.load %arg4[%c0_6, %c0_7] : memref<8x64xbf16, #tpu.memory_space<vmem>>, vector<8x64xbf16>
    %10 = arith.truncf %8 : vector<64x128xf32> to vector<64x128xbf16>
    %cst_8 = arith.constant dense<0.000000e+00> : vector<8x128xf32>
    %11 = tpu.matmul %9, %10, %cst_8 {dimension_numbers = #tpu.dot_dimension_numbers<[1], [0], [0], [1], [0, 0, 1, 1], [], []>} : vector<8x64xbf16>, vector<64x128xbf16>, vector<8x128xf32> -> vector<8x128xf32>
    %c0_9 = arith.constant 0 : index
    %c0_10 = arith.constant 0 : index
    %12 = vector.load %arg5[%c0_9, %c0_10] : memref<8x1xf32, #tpu.memory_space<vmem>>, vector<8x1xf32>
    %13 = vector.broadcast %12 : vector<8x1xf32> to vector<8x128xf32>
    %14 = arith.addf %11, %13 : vector<8x128xf32>
    %c0_11 = arith.constant 0 : index
    %c0_12 = arith.constant 0 : index
    %15 = vector.load %arg6[%c0_11, %c0_12] : memref<8x128xf32, #tpu.memory_space<vmem>>, vector<8x128xf32>
    tpu.vector_store %arg6[%c0_11, %c0_12], %14 {strides = array<i32>} : memref<8x128xf32, #tpu.memory_space<vmem>>, vector<8x128xf32>,
    return
  }
  func.func @transform_0(%arg0: i32) -> (i32, i32) {
    %c0_i32 = arith.constant 0 : i32
    %c0_i32_0 = arith.constant 0 : i32
    return %arg0, %c0_i32 : i32, i32
  }
  func.func @transform_1(%arg0: i32) -> (i32, i32) {
    %c0_i32 = arith.constant 0 : i32
    %c0_i32_0 = arith.constant 0 : i32
    %c0_i32_1 = arith.constant 0 : i32
    return %c0_i32, %c0_i32_0 : i32, i32
  }
  func.func @transform_2(%arg0: i32) -> (i32, i32) {
    %c0_i32 = arith.constant 0 : i32
    %c0_i32_0 = arith.constant 0 : i32
    %c0_i32_1 = arith.constant 0 : i32
    return %c0_i32, %c0_i32_0 : i32, i32
  }
  func.func @transform_3(%arg0: i32) -> (i32, i32) {
    %c0_i32 = arith.constant 0 : i32
    %c0_i32_0 = arith.constant 0 : i32
    %c0_i32_1 = arith.constant 0 : i32
    return %c0_i32, %c0_i32_0 : i32, i32
  }
  func.func @transform_4(%arg0: i32) -> (i32, i32) {
    %c0_i32 = arith.constant 0 : i32
    %c0_i32_0 = arith.constant 0 : i32
    %c0_i32_1 = arith.constant 0 : i32
    return %c0_i32, %c0_i32_0 : i32, i32
  }
  func.func @transform_5(%arg0: i32) -> (i32, i32) {
    %c0_i32 = arith.constant 0 : i32
    %c0_i32_0 = arith.constant 0 : i32
    return %c0_i32, %arg0 : i32, i32
  }
}

</mosaic_0001>

<bundles_post_ra>
// kernel: tpu_custom_call.1
= control target key start
LH: loop header
LB: loop body
LE: loop exit
PB: predicated region body
PF: predicated region fallthrough
CT: control target
= control target key end

     0   :  { %vm122_vm0 = vcmask 285696   ;;  %s450_s0 = inlined_call_operand.vmem [shape: f32[128,35], index: 0, kind: input, shape index: {}]   ;;  %s451_s1 = inlined_call_operand.vmem [shape: bf16[64,35], index: 1, kind: input, shape index: {}]   ;;  %s452_s2 = inlined_call_operand.vmem [shape: f32[64,1], index: 2, kind: input, shape index: {}]   ;;  %s453_s3 = inlined_call_operand.vmem [shape: bf16[8,64], index: 3, kind: input, shape index: {}]   ;;  %s454_s4 = inlined_call_operand.vmem [shape: f32[8,1], index: 4, kind: input, shape index: {}]   ;;  %s455_s5 = inlined_call_operand.hbm [shape: f32[8,128], index: 5, kind: output, shape index: {}]  }
   0x1   :  { %v36_v0 = vld [vmem:[%s450_s0 + $0x70] sm:$0xff]  ;;  %v37_v1 = vld [vmem:[%s450_s0 + $0x78] sm:$0xff]  ;;  %v34_v3 = vld [vmem:[%s450_s0 + $0x60] sm:$0xff] }
   0x2   :  { %v45_v2 = vpack.c.bf16 %v37_v1, %v36_v0  ;;  %v35_v4 = vld [vmem:[%s450_s0 + $0x68] sm:$0xff] }
   0x4   :  { %v157_v5 = vsel %vm122_vm0, %v45_v2, 0 }
   0x5   :  { %10 = vsyncpa [#allocation3], 0  ;;  %267 = vmatpush.bf16.xpose.msra.mxu3 %v157_v5  ;;  %159 = vmatpush.bf16.xpose.msra.mxu0 %v157_v5  ;;  %v44_v6 = vpack.c.bf16 %v35_v4, %v34_v3  ;;  %v32_v8 = vld [vmem:[%s450_s0 + $0x50] sm:$0xff]  ;;  %v33_v9 = vld [vmem:[%s450_s0 + $0x58] sm:$0xff]  ;;  %v313_v23 = vmov 0   ;;  %vm207_vm1 = vcmask 523264  }
   0x6   :  { %266 = vmatpush.bf16.xpose.msra.mxu2 %v157_v5  ;;  %v43_v10 = vpack.c.bf16 %v33_v9, %v32_v8  ;;  %v30_v12 = vld [vmem:[%s450_s0 + $0x40] sm:$0xff]  ;;  %v31_v13 = vld [vmem:[%s450_s0 + $0x48] sm:$0xff]  ;;  %v28_v16 = vld [vmem:[%s450_s0 + $0x30] sm:$0xff]  ;;  %285 = vset.pattern.permute.xlu1 %v313_v23  ;;  %s232_s28 = sshll.u32 %s455_s5, 4  ;;  %s233_s28 = int_to_ptr.hbm [resolvable:$true] %s232_s28 }
   0x7   :  { %v154_v7 = vsel %vm122_vm0, %v44_v6, 0  ;;  %v42_v14 = vpack.c.bf16 %v31_v13, %v30_v12  ;;  %v29_v17 = vld [vmem:[%s450_s0 + $0x38] sm:$0xff]  ;;  %v26_v20 = vld [vmem:[%s450_s0 + $0x20] sm:$0xff]  ;;  %v27_v21 = vld [vmem:[%s450_s0 + $0x28] sm:$0xff]  ;;  %284 = vset.pattern.permute.xlu0 %v313_v23  ;;  %286 = vset.pattern.permute.xlu2 %v313_v23 }
   0x8   :  { %v151_v11 = vsel %vm122_vm0, %v43_v10, 0  ;;  %v41_v18 = vpack.c.bf16 %v29_v17, %v28_v16  ;;  %v40_v22 = vpack.c.bf16 %v27_v21, %v26_v20  ;;  %v24_v25 = vld [vmem:[%s450_s0 + $0x10] sm:$0xff]  ;;  %v25_v26 = vld [vmem:[%s450_s0 + $0x18] sm:$0xff]  ;;  %v22_v29 = vld [vmem:[%s450_s0] sm:$0xff] }
   0x9   :  { %v148_v15 = vsel %vm122_vm0, %v42_v14, 0  ;;  %v39_v27 = vpack.c.bf16 %v25_v26, %v24_v25  ;;  %v23_v30 = vld [vmem:[%s450_s0 + $0x8] sm:$0xff]  ;;  %v60_v31 = vld [vmem:[%s452_s2 + $0x30] sm:$0xff]  ;;  %v58_v32 = vld [vmem:[%s452_s2 + $0x20] sm:$0xff] }
   0xa   :  { %v145_v19 = vsel %vm122_vm0, %v41_v18, 0  ;;  %v142_v24 = vsel %vm122_vm0, %v40_v22, 0  ;;  %v38_v33 = vpack.c.bf16 %v23_v30, %v22_v29  ;;  %94 = vperm.xlu0 %284, %v60_v31   ;;  %v56_v34 = vld [vmem:[%s452_s2 + $0x10] sm:$0xff]  ;;  %84 = vperm.xlu1 %285, %v58_v32   ;;  %v61_v36 = vld [vmem:[%s452_s2 + $0x38] sm:$0xff]  ;;  %v59_v37 = vld [vmem:[%s452_s2 + $0x28] sm:$0xff] }
   0xb   :  { %v139_v28 = vsel %vm122_vm0, %v39_v27, 0  ;;  %74 = vperm.xlu2 %286, %v56_v34   ;;  %v57_v38 = vld [vmem:[%s452_s2 + $0x18] sm:$0xff]  ;;  %v264_v39 = vld [vmem:[%s451_s1 + $0x10] sm:$0xff]  ;;  %v262_v40 = vld [vmem:[%s451_s1] sm:$0xff] }
   0xc   :  { %v136_v35 = vsel %vm122_vm0, %v38_v33, 0  ;;  %v263_v41 = vld [vmem:[%s451_s1 + $0x8] sm:$0xff]  ;;  %v54_v42 = vld [vmem:[%s452_s2] sm:$0xff]  ;;  %v265_v45 = vld [vmem:[%s451_s1 + $0x18] sm:$0xff] }
   0xd   :  { %269 = vmatpush.bf16.xpose.msra.mxu3 %v154_v7  ;;  %160 = vmatpush.bf16.xpose.msra.mxu0 %v154_v7  ;;  %v55_v43 = vld [vmem:[%s452_s2 + $0x8] sm:$0xff]  ;;  %v201_v44 = vld [vmem:[%s454_s4] sm:$0xff]  ;;  %s314_s4 = smov [#allocation2]  }
   0xe   :  { %268 = vmatpush.bf16.xpose.msra.mxu2 %v154_v7  ;;  %v196_v18 = vld [vmem:[%s453_s3] sm:$0xf]  ;;  %s230_s25 = sshll.u32 %s314_s4, 4  ;;  %s231_s25 = int_to_ptr.vmem [resolvable:$true] %s230_s25 }
  0x12   :  { %99 = vperm.xlu0 %284, %v61_v36   ;;  %89 = vperm.xlu1 %285, %v59_v37  }
  0x13   :  { %79 = vperm.xlu2 %286, %v57_v38  }
  0x15   :  { %271 = vmatpush.bf16.xpose.msra.mxu3 %v151_v11  ;;  %161 = vmatpush.bf16.xpose.msra.mxu0 %v151_v11 }
  0x16   :  { %270 = vmatpush.bf16.xpose.msra.mxu2 %v151_v11 }
  0x1a   :  { %64 = vperm.xlu0 %284, %v54_v42   ;;  %69 = vperm.xlu1 %285, %v55_v43  }
  0x1b   :  { %204 = vperm.xlu2 %286, %v201_v44  }
  0x1d   :  { %273 = vmatpush.bf16.xpose.msra.mxu3 %v148_v15  ;;  %162 = vmatpush.bf16.xpose.msra.mxu0 %v148_v15 }
  0x1e   :  { %272 = vmatpush.bf16.xpose.msra.mxu2 %v148_v15 }
  0x25   :  { %275 = vmatpush.bf16.xpose.msra.mxu3 %v145_v19  ;;  %163 = vmatpush.bf16.xpose.msra.mxu0 %v145_v19 }
  0x26   :  { %274 = vmatpush.bf16.xpose.msra.mxu2 %v145_v19 }
  0x2d   :  { %277 = vmatpush.bf16.xpose.msra.mxu3 %v142_v24  ;;  %164 = vmatpush.bf16.xpose.msra.mxu0 %v142_v24 }
  0x2e   :  { %276 = vmatpush.bf16.xpose.msra.mxu2 %v142_v24 }
  0x35   :  { %279 = vmatpush.bf16.xpose.msra.mxu3 %v139_v28  ;;  %165 = vmatpush.bf16.xpose.msra.mxu0 %v139_v28 }
  0x36   :  { %278 = vmatpush.bf16.xpose.msra.mxu2 %v139_v28 }
  0x3d   :  { %281 = vmatpush.bf16.xpose.msra.mxu3 %v136_v35  ;;  %166 = vmatpush.bf16.xpose.msra.mxu0 %v136_v35 }
  0x3e   :  { %280 = vmatpush.bf16.xpose.msra.mxu2 %v136_v35 }
  0x44   :  { %259 = vmatmul.msk.bf16.vlgmr.msra.gmra.mxu3 %vm122_vm0, %v264_v39  ;;  %257 = vmatmul.msk.bf16.vlgmr.msra.gmra.mxu0 %vm122_vm0, %v262_v40 }
  0x45   :  { %258 = vmatmul.msk.bf16.vlgmr.msra.gmra.mxu2 %vm122_vm0, %v263_v41 }
  0x54   :  { %260 = vmatmul.msk.bf16.gmra.mxu3 %vm122_vm0, %v265_v45 }
  0x65   :  { %v75_v52 = vpop.permute.xlu2 %74 }
  0x6d   :  { %v80_v0 = vpop.permute.xlu2 %79 }
  0x75   :  { %v205_v19 = vpop.permute.xlu2 %204 }
  0x7c   :  { %v95_v48 = vpop.permute.xlu0 %94  ;;  %v85_v49 = vpop.permute.xlu1 %84 }
  0x84   :  { %v100_v53 = vpop.permute.xlu0 %99  ;;  %v90_v54 = vpop.permute.xlu1 %89 }
  0x8c   :  { %v65_v2 = vpop.permute.xlu0 %64  ;;  %v70_v6 = vpop.permute.xlu1 %69 }
  0xc1   :  { %v168_v55 = vpop.f32.mrf.mxu0 }
  0xc2   :  { %v169_v9 = vadd.f32 %v168_v55, %v65_v2 }
  0xc4   :  { %v188_v14 = vmax.f32 %v169_v9, 0.0 }
  0xc7   :  { %v178_v46 = vpop.f32.mrf.mxu3 }
  0xc8   :  { %v173_v50 = vpop.f32.mrf.mxu2  ;;  %v179_v61 = vadd.f32 %v178_v46, %v85_v49 }
  0xc9   :  { %v174_v3 = vadd.f32 %v173_v50, %v75_v52  ;;  %v170_v7 = vpop.f32.mrf.mxu0 }
  0xca   :  { %v192_v8 = vmax.f32 %v179_v61, 0.0  ;;  %v171_v10 = vadd.f32 %v170_v7, %v70_v6 }
  0xcb   :  { %v190_v11 = vmax.f32 %v174_v3, 0.0 }
  0xcc   :  { %v189_v15 = vmax.f32 %v171_v10, 0.0 }
  0xce   :  { %v197_v17 = vpack.c.bf16 %v189_v15, %v188_v14 }
  0xcf   :  { %v180_v47 = vpop.f32.mrf.mxu3 }
  0xd0   :  { %v181_v58 = vadd.f32 %v180_v47, %v90_v54  ;;  %v175_v60 = vpop.f32.mrf.mxu2 }
  0xd1   :  { %v176_v4 = vadd.f32 %v175_v60, %v80_v0 }
  0xd2   :  { %v193_v1 = vmax.f32 %v181_v58, 0.0 }
  0xd3   :  { %v191_v12 = vmax.f32 %v176_v4, 0.0 }
  0xd4   :  { %v199_v13 = vpack.c.bf16 %v193_v1, %v192_v8 }
  0xd5   :  { %v198_v16 = vpack.c.bf16 %v191_v12, %v190_v11 }
  0xd7   :  { %v183_v51 = vpop.f32.mrf.mxu3 }
  0xd8   :  { %v184_v56 = vadd.f32 %v183_v51, %v95_v48 }
  0xda   :  { %v194_v62 = vmax.f32 %v184_v56, 0.0 }
  0xdf   :  { %v185_v57 = vpop.f32.mrf.mxu3 }
  0xe0   :  { %v186_v59 = vadd.f32 %v185_v57, %v100_v53 }
  0xe2   :  { %v195_v63 = vmax.f32 %v186_v59, 0.0 }
  0xe4   :  { %v200_v5 = vpack.c.bf16 %v195_v63, %v194_v62 }
  0xe6   :  { %215 = vmatpush.bf16.msra.mxu1 %v200_v5 }
  0xea   :  { %216 = vmatpush.bf16.msra.mxu1 %v199_v13 }
  0xee   :  { %217 = vmatpush.bf16.msra.mxu1 %v198_v16 }
  0xf2   :  { %218 = vmatpush.bf16.msra.mxu1 %v197_v17 }
  0xf5   :  { %261 = vmatmul.msk.bf16.vlgmr.msra.gmra.mxu1 %vm207_vm1, %v196_v18 }
 0x172   :  { %v220_v20 = vpop.f32.mrf.mxu1 }
 0x173   :  { %v221_v21 = vadd.f32 %v220_v20, %v205_v19 }
 0x175   :  { %224 = vst [vmem:[#allocation2] sm:$0xff] %v221_v21 }
 0x176   :  { %235 = dma.vmem_to_hbm [thread:$0]  %s231_s25, 128, %s233_s28, [#allocation3]  }
 0x17a   :  { %v222_v22 = vpop.f32.mrf.mxu1 }
 0x17b   :  { %311 = dma.done.wait [#allocation3], 128  }
 0x17c   :  { %312 = vsyncadd [#allocation3], 4294967168 }
 0x17d   :  { %240 = vsyncpa [#allocation3], 1 }

</bundles_post_ra>
